<compile_context>
chip_gen: v5e
topology: v5e:2x2
jax: 0.10.0
libtpu: 0.0.40
codegen_flags: <defaults>
</compile_context>

<pallas_src>
import functools

import jax
import jax.numpy as jnp
from jax import lax
from jax.experimental import pallas as pl
from jax.experimental.pallas import tpu as pltpu


_NEG_BIG = -1e30  # finite "-inf": keeps 0 * (-big) finite (no NaN in selects/sums)


def _round_up(x, m):
    return (x + m - 1) // m * m


def _pad2(a, rows, cols):
    return jnp.pad(a, ((0, rows - a.shape[0]), (0, cols - a.shape[1])))


def _default_vmem_limit_bytes():
    phys = 128 * 1024 * 1024
    try:  # generation-aware: ~3/4 of physical VMEM, capped at 100 MiB
        phys = int(pltpu.get_tpu_info().vmem_capacity_bytes)
    except Exception:  # non-TPU backend / older API: keep a safe default
        pass
    return int(min(phys * 3 // 4, 100 * 1024 * 1024))


def _default_edge_tile(n_pad, n_edges, max_te):
    # Keep the [N_pad, TE]-shaped f32 intermediates (one-hot / selects, ~4 live
    # at once) under ~16 MiB, then take the largest lane-aligned tile.
    cap = max(128, ((16 * 1024 * 1024) // (16 * n_pad)) // 128 * 128)
    te = min(max_te, cap)
    te = min(te, max(128, _round_up(n_edges, 128)))
    return max(128, te)


# -----------------------------------------------------------------------------
# Pass 1: filter MLP, messages, scores, online per-target (max, denominator)
# -----------------------------------------------------------------------------
def _cfconv_stats_kernel(ea_ref, sf_ref, tgt_ref,
                         w1_ref, b1_ref, w2_ref, b2_ref, av_ref,
                         msg_ref, sc_ref, m_ref, l_ref):
    f32 = jnp.float32
    t = pl.program_id(1)          # edge-tile index within this split
    n_pad = m_ref.shape[0]
    te = ea_ref.shape[0]

    @pl.when(t == 0)
    def _():
        m_ref[...] = jnp.full((n_pad, 1), _NEG_BIG, f32)
        l_ref[...] = jnp.zeros((n_pad, 1), f32)

    # bf16 streams are upcast in-register; MXU runs single-pass bf16 anyway.
    ea = ea_ref[...].astype(f32)
    sf = sf_ref[...].astype(f32)

    # --- filter network: Linear -> tanh -> Linear -> tanh (plain_last=False) --
    h = jnp.tanh(jnp.dot(ea, w1_ref[...],
                         preferred_element_type=f32) + b1_ref[...])       # [TE, Hp]
    edge_w = jnp.tanh(jnp.dot(h, w2_ref[...],
                              preferred_element_type=f32) + b2_ref[...])  # [TE, Cp]

    msg = sf * edge_w                                                     # [TE, Cp]
    msg_ref[...] = msg.astype(msg_ref.dtype)                              # bf16 stream

    # attention score per edge as a lane-dense [1, TE] row (MXU mat-vec).
    score = lax.dot_general(av_ref[...], msg, (((1,), (1,)), ((), ())),
                            preferred_element_type=f32)                   # [1, TE]
    sc_ref[...] = score

    # target one-hot: nodes on sublanes, edges on lanes.  Padded edges carry
    # tgt == n_pad (outside the iota range) -> all-zero column -> no effect.
    node_iota = lax.broadcasted_iota(jnp.int32, (n_pad, te), 0)
    ohT = tgt_ref[...] == node_iota                                       # [Np, TE]

    # --- online segment-softmax statistics ------------------------------------
    m_old = m_ref[...]                                                    # [Np, 1]
    l_old = l_ref[...]                                                    # [Np, 1]
    tile_max = jnp.max(jnp.where(ohT, score, _NEG_BIG),
                       axis=1, keepdims=True)                             # [Np, 1]
    m_new = jnp.maximum(m_old, tile_max)
    corr = jnp.exp(m_old - m_new)
    # gather the (already-updated) running max back per edge: [1, TE]
    m_g = jnp.sum(jnp.where(ohT, m_new, 0.0), axis=0, keepdims=True)
    p = jnp.exp(score - m_g)                                              # <= 1
    l_add = jnp.sum(jnp.where(ohT, p, 0.0), axis=1, keepdims=True)        # [Np, 1]

    m_ref[...] = m_new
    l_ref[...] = l_old * corr + l_add


# -----------------------------------------------------------------------------
# Pass 2: softmax weights per edge + weighted scatter-add into output[target]
# -----------------------------------------------------------------------------
def _cfconv_apply_kernel(msg_ref, sc_ref, tgt_ref, m_ref, l_ref,
                         out_ref, attn_ref):
    f32 = jnp.float32
    t = pl.program_id(1)
    n_pad = out_ref.shape[0]
    te = msg_ref.shape[0]

    @pl.when(t == 0)
    def _():
        out_ref[...] = jnp.zeros(out_ref.shape, f32)

    node_iota = lax.broadcasted_iota(jnp.int32, (n_pad, te), 0)
    ohT = tgt_ref[...] == node_iota                                       # [Np, TE]

    # gather the merged per-node stats back per edge (exact f32 select+reduce)
    m_g = jnp.sum(jnp.where(ohT, m_ref[...], 0.0), axis=0, keepdims=True)  # [1, TE]
    l_g = jnp.sum(jnp.where(ohT, l_ref[...], 0.0), axis=0, keepdims=True)  # [1, TE]

    score = sc_ref[...]                                                    # [1, TE]
    valid = l_g > 0.0                                                      # padded edges -> False
    denom = jnp.where(valid, l_g, 1.0)
    attn = jnp.where(valid, jnp.exp(score - m_g) * pl.reciprocal(denom), 0.0)
    attn_ref[...] = attn                                                   # exact f32 row

    # fold the attention weight into the one-hot; with bf16 messages a single
    # DEFAULT-precision MXU pass is the right choice (vs the old 6-pass f32).
    w_ohT = jnp.where(ohT, attn, 0.0)                                      # [Np, TE]
    out_ref[...] += lax.dot_general(
        w_ohT, msg_ref[...].astype(f32), (((1,), (0,)), ((), ())),
        preferred_element_type=f32)                                        # [Np, Cp]


# -----------------------------------------------------------------------------
# Wrappers
# -----------------------------------------------------------------------------
@functools.partial(jax.jit, static_argnames=("edge_tile", "vmem_limit_bytes"))
def _manual_cfconv_impl(x, edge_index, edge_attr, params, *, edge_tile,
                        vmem_limit_bytes):
    f32, bf16 = jnp.float32, jnp.bfloat16
    N, C = x.shape
    E, F = edge_attr.shape

    C_pad = _round_up(C, 128)
    F_pad = _round_up(F, 128)
    H_pad = _round_up(params["w1"].shape[1], 128)
    N_pad = _round_up(N, 8)
    TE = edge_tile
    n_tiles = -(-E // TE)
    # 2-way "parallel" split: sharded across both TCs on v7x; near-free on 1-TC chips.
    n_split = 2 if n_tiles >= 2 else 1
    n_tiles = _round_up(n_tiles, n_split)
    tps = n_tiles // n_split
    E_pad = n_tiles * TE

    src = edge_index[0].astype(jnp.int32)
    tgt = edge_index[1].astype(jnp.int32)

    # parameters: f32, channel-padded to lane multiples (zero padding is exact)
    w1 = _pad2(params["w1"].astype(f32), F_pad, H_pad)
    b1 = _pad2(params["b1"].astype(f32), 1, H_pad)
    w2 = _pad2(params["w2"].astype(f32), H_pad, C_pad)
    b2 = _pad2(params["b2"].astype(f32), 1, C_pad)
    attn_vec = _pad2(params["attn_vec"].astype(f32).reshape(1, C), 1, C_pad)

    # dominant per-edge streams in bf16 (halves HBM bytes + per-buffer VMEM)
    edge_attr_p = _pad2(edge_attr.astype(bf16), E_pad, F_pad)
    # Source-feature gather: bandwidth-proportional XLA gather (moves E*C values).
    src_feat_p = _pad2(jnp.take(x, src, axis=0).astype(bf16), E_pad, C_pad)

    # target indices as a lane-dense int32 row; padded edges -> sentinel N_pad
    # (never matches a node), so they contribute nothing anywhere.
    tgt_row = jnp.pad(tgt, (0, E_pad - E),
                      constant_values=N_pad).reshape(1, E_pad)

    cparams = pltpu.CompilerParams(
        dimension_semantics=("parallel", "arbitrary"),
        vmem_limit_bytes=vmem_limit_bytes,
    )

    e_idx = lambda p, t: (p * tps + t, 0)    # edge tile along sublanes
    e_row = lambda p, t: (0, p * tps + t)    # edge tile along lanes
    const = lambda p, t: (0, 0)
    split = lambda p, t: (p, 0)              # per-split partial block

    cost1 = pl.CostEstimate(
        flops=2 * E_pad * H_pad * (F_pad + C_pad) + 2 * E_pad * C_pad
        + 12 * E_pad * N_pad,
        transcendentals=E_pad * (H_pad + C_pad + 1) + n_tiles * N_pad,
        bytes_accessed=2 * E_pad * (F_pad + 2 * C_pad)
        + 4 * (2 * E_pad + F_pad * H_pad + H_pad * C_pad + 4 * n_split * N_pad),
    )

    msgs, scores, m_part, l_part = pl.pallas_call(
        _cfconv_stats_kernel,
        grid=(n_split, tps),
        in_specs=[
            pl.BlockSpec((TE, F_pad), e_idx),      # edge_attr (bf16)
            pl.BlockSpec((TE, C_pad), e_idx),      # gathered x[src] (bf16)
            pl.BlockSpec((1, TE), e_row),          # target ids (lane-dense)
            pl.BlockSpec((F_pad, H_pad), const),   # w1
            pl.BlockSpec((1, H_pad), const),       # b1
            pl.BlockSpec((H_pad, C_pad), const),   # w2
            pl.BlockSpec((1, C_pad), const),       # b2
            pl.BlockSpec((1, C_pad), const),       # attention vector
        ],
        out_specs=(
            pl.BlockSpec((TE, C_pad), e_idx),      # messages (bf16)
            pl.BlockSpec((1, TE), e_row),          # scores (lane-dense)
            pl.BlockSpec((N_pad, 1), split),       # per-split node max (resident)
            pl.BlockSpec((N_pad, 1), split),       # per-split node denom (resident)
        ),
        out_shape=(
            jax.ShapeDtypeStruct((E_pad, C_pad), bf16),
            jax.ShapeDtypeStruct((1, E_pad), f32),
            jax.ShapeDtypeStruct((n_split * N_pad, 1), f32),
            jax.ShapeDtypeStruct((n_split * N_pad, 1), f32),
        ),
        compiler_params=cparams,
        cost_estimate=cost1,
    )(edge_attr_p, src_feat_p, tgt_row, w1, b1, w2, b2, attn_vec)

    # combine per-split online-softmax stats (tiny [n_split, N_pad] merge)
    m_parts = m_part.reshape(n_split, N_pad, 1)
    l_parts = l_part.reshape(n_split, N_pad, 1)
    m_tot = jnp.max(m_parts, axis=0)                                      # [Np, 1]
    l_tot = jnp.sum(l_parts * jnp.exp(m_parts - m_tot[None]), axis=0)      # [Np, 1]

    cost2 = pl.CostEstimate(
        flops=2 * E_pad * N_pad * C_pad + 10 * E_pad * N_pad,
        transcendentals=E_pad,
        bytes_accessed=2 * E_pad * C_pad
        + 4 * (3 * E_pad + n_split * N_pad * C_pad + 2 * N_pad),
    )

    out_part, attn_p = pl.pallas_call(
        _cfconv_apply_kernel,
        grid=(n_split, tps),
        in_specs=[
            pl.BlockSpec((TE, C_pad), e_idx),      # messages (bf16)
            pl.BlockSpec((1, TE), e_row),          # scores
            pl.BlockSpec((1, TE), e_row),          # target ids
            pl.BlockSpec((N_pad, 1), const),       # merged per-node max
            pl.BlockSpec((N_pad, 1), const),       # merged per-node denom
        ],
        out_specs=(
            pl.BlockSpec((N_pad, C_pad), split),   # per-split partial output (resident)
            pl.BlockSpec((1, TE), e_row),          # attention weights (lane-dense)
        ),
        out_shape=(
            jax.ShapeDtypeStruct((n_split * N_pad, C_pad), f32),
            jax.ShapeDtypeStruct((1, E_pad), f32),
        ),
        compiler_params=cparams,
        cost_estimate=cost2,
    )(msgs, scores, tgt_row, m_tot, l_tot)

    out = jnp.sum(out_part.reshape(n_split, N_pad, C_pad), axis=0)
    return out[:N, :C], attn_p[0, :E]


def manual_cfconv(x, edge_index, edge_attr, params, *, edge_tile=None,
                  vmem_limit_bytes=None):
    """Returns (output [N, C], attention_weights [E])."""
    N = x.shape[0]
    E = edge_attr.shape[0]
    n_pad = _round_up(max(N, 1), 8)
    vl = (int(vmem_limit_bytes) if vmem_limit_bytes is not None
          else _default_vmem_limit_bytes())
    if edge_tile is None:
        max_te = 4096 if vl >= 80 * 1024 * 1024 else 2048
        te = _default_edge_tile(n_pad, E, max_te)
    else:
        te = max(128, _round_up(min(int(edge_tile), max(E, 1)), 128))
    return _manual_cfconv_impl(x, edge_index, edge_attr, params,
                               edge_tile=te, vmem_limit_bytes=vl)


# -----------------------------------------------------------------------------
# Pure-JAX reference mirroring the PyTorch forward
# -----------------------------------------------------------------------------
def reference(x, edge_index, edge_attr, params):
    h = jnp.tanh(edge_attr @ params["w1"] + params["b1"])
    ew = jnp.tanh(h @ params["w2"] + params["b2"])
    src, tgt = edge_index[0], edge_index[1]
    msg = x[src] * ew
    scores = (msg @ params["attn_vec"])[:, 0]
    same = tgt[:, None] == tgt[None, :]
    seg_max = jnp.max(jnp.where(same, scores[None, :], -jnp.inf), axis=1)
    exp_all = jnp.where(same, jnp.exp(scores[None, :] - seg_max[:, None]), 0.0)
    attn_w = jnp.exp(scores - seg_max) / exp_all.sum(axis=1)
    msg = msg * attn_w[:, None]
    out = jnp.zeros_like(x).at[tgt].add(msg)
    return out, attn_w


def _make_inputs(key, N, C, F, H, E):
    ks = jax.random.split(key, 9)
    x = jax.random.normal(ks[0], (N, C), dtype=jnp.float32)
    edge_attr = jax.random.normal(ks[1], (E, F), dtype=jnp.float32)
    edge_index = jnp.stack([
        jax.random.randint(ks[2], (E,), 0, N),
        jax.random.randint(ks[3], (E,), 0, N),
    ]).astype(jnp.int32)
    params = {
        "w1": 0.3 * jax.random.normal(ks[4], (F, H), dtype=jnp.float32),
        "b1": 0.1 * jax.random.normal(ks[5], (1, H), dtype=jnp.float32),
        "w2": 0.3 * jax.random.normal(ks[6], (H, C), dtype=jnp.float32),
        "b2": 0.1 * jax.random.normal(ks[7], (1, C), dtype=jnp.float32),
        "attn_vec": 0.5 * jax.random.normal(ks[8], (C, 1), dtype=jnp.float32),
    }
    return x, edge_index, edge_attr, params


if __name__ == "__main__":
    key = jax.random.PRNGKey(0)

    # Tolerances reflect the intentional bf16 streaming + single-pass MXU
    # (structural bugs would produce O(1) errors, far above these).
    ATOL, RTOL = 2e-2, 2e-2

    # Case 1: tiny graph, single edge tile (shapes consistent with the module;
    # in_channels == out_channels).
    x, ei, ea, params = _make_inputs(jax.random.fold_in(key, 0),
                                     N=8, C=4, F=6, H=16, E=16)
    out, attn = manual_cfconv(x, ei, ea, params)
    jax.block_until_ready((out, attn))
    out_ref, attn_ref = reference(x, ei, ea, params)
    assert jnp.allclose(out, out_ref, atol=ATOL, rtol=RTOL), "case1 output mismatch"
    assert jnp.allclose(attn, attn_ref, atol=ATOL, rtol=RTOL), "case1 attention mismatch"

    # Case 2: E >> edge_tile -> exercises the multi-tile online-softmax carry,
    # the 2-way "parallel" split + stats merge, and padded edge tiles.
    x, ei, ea, params = _make_inputs(jax.random.fold_in(key, 1),
                                     N=24, C=4, F=6, H=16, E=600)
    out, attn = manual_cfconv(x, ei, ea, params, edge_tile=128)
    jax.block_until_ready((out, attn))
    out_ref, attn_ref = reference(x, ei, ea, params)
    assert jnp.allclose(out, out_ref, atol=ATOL, rtol=RTOL), "case2 output mismatch"
    assert jnp.allclose(attn, attn_ref, atol=ATOL, rtol=RTOL), "case2 attention mismatch"

    print("KERNEL_OK")
</pallas_src>

<mosaic_0001>
module attributes {stable_mosaic.version = 11 : i64} {
  func.func @_cfconv_apply_kernel(%arg0: i32, %arg1: i32, %arg2: memref<128x128xbf16, #tpu.memory_space<vmem>>, %arg3: memref<1x128xf32, #tpu.memory_space<vmem>>, %arg4: memref<1x128xi32, #tpu.memory_space<vmem>>, %arg5: memref<8x1xf32, #tpu.memory_space<vmem>>, %arg6: memref<8x1xf32, #tpu.memory_space<vmem>>, %arg7: memref<8x128xf32, #tpu.memory_space<vmem>>, %arg8: memref<1x128xf32, #tpu.memory_space<vmem>>) attributes {dimension_semantics = [#tpu.dimension_semantics<parallel>, #tpu.dimension_semantics<arbitrary>], iteration_bounds = array<i64: 1, 1>, scalar_prefetch = 0 : i64, scratch_operands = 0 : i64, tpu.core_type = #tpu.core_type<tc>, window_params = [{transform_indices = @transform_0, window_bounds = array<i64: 128, 128>}, {transform_indices = @transform_1, window_bounds = array<i64: 1, 128>}, {transform_indices = @transform_2, window_bounds = array<i64: 1, 128>}, {pipeline_mode = #tpu.pipeline_mode<synchronous>, transform_indices = @transform_3, window_bounds = array<i64: 8, 1>}, {pipeline_mode = #tpu.pipeline_mode<synchronous>, transform_indices = @transform_4, window_bounds = array<i64: 8, 1>}, {transform_indices = @transform_5, window_bounds = array<i64: 8, 128>}, {transform_indices = @transform_6, window_bounds = array<i64: 1, 128>}]} {
    %c0_i32 = arith.constant 0 : i32
    %0 = arith.cmpi eq, %arg1, %c0_i32 : i32
    %1 = arith.extui %0 : i1 to i32
    %c0_i32_0 = arith.constant 0 : i32
    %2 = arith.cmpi ne, %1, %c0_i32_0 : i32
    scf.if %2 {
      %cst_24 = arith.constant 0.000000e+00 : f32
      %43 = vector.broadcast %cst_24 : f32 to vector<8x128xf32>
      %c0_25 = arith.constant 0 : index
      %c0_26 = arith.constant 0 : index
      %44 = vector.load %arg7[%c0_25, %c0_26] : memref<8x128xf32, #tpu.memory_space<vmem>>, vector<8x128xf32>
      tpu.vector_store %arg7[%c0_25, %c0_26], %43 {strides = array<i32>} : memref<8x128xf32, #tpu.memory_space<vmem>>, vector<8x128xf32>,
    } else {
    }
    %3 = tpu.iota {dimensions = array<i32: 0>} : vector<8x128xi32>
    %c0 = arith.constant 0 : index
    %c0_1 = arith.constant 0 : index
    %4 = vector.load %arg4[%c0, %c0_1] : memref<1x128xi32, #tpu.memory_space<vmem>>, vector<1x128xi32>
    %5 = vector.broadcast %4 : vector<1x128xi32> to vector<8x128xi32>
    %6 = arith.cmpi eq, %5, %3 : vector<8x128xi32>
    %c0_2 = arith.constant 0 : index
    %c0_3 = arith.constant 0 : index
    %7 = vector.load %arg5[%c0_2, %c0_3] : memref<8x1xf32, #tpu.memory_space<vmem>>, vector<8x1xf32>
    %cst = arith.constant 0.000000e+00 : f32
    %8 = vector.shape_cast %7 : vector<8x1xf32> to vector<8x1xf32>
    %9 = vector.broadcast %8 : vector<8x1xf32> to vector<8x128xf32>
    %10 = vector.broadcast %cst : f32 to vector<8x128xf32>
    %11 = arith.select %6, %9, %10 : vector<8x128xi1>, vector<8x128xf32>
    %cst_4 = arith.constant dense<0.000000e+00> : vector<128xf32>
    %12 = vector.multi_reduction <add>, %11, %cst_4 [0] : vector<8x128xf32> to vector<128xf32>
    %13 = vector.shape_cast %12 : vector<128xf32> to vector<1x128xf32>
    %c0_5 = arith.constant 0 : index
    %c0_6 = arith.constant 0 : index
    %14 = vector.load %arg6[%c0_5, %c0_6] : memref<8x1xf32, #tpu.memory_space<vmem>>, vector<8x1xf32>
    %cst_7 = arith.constant 0.000000e+00 : f32
    %15 = vector.shape_cast %14 : vector<8x1xf32> to vector<8x1xf32>
    %16 = vector.broadcast %15 : vector<8x1xf32> to vector<8x128xf32>
    %17 = vector.broadcast %cst_7 : f32 to vector<8x128xf32>
    %18 = arith.select %6, %16, %17 : vector<8x128xi1>, vector<8x128xf32>
    %cst_8 = arith.constant dense<0.000000e+00> : vector<128xf32>
    %19 = vector.multi_reduction <add>, %18, %cst_8 [0] : vector<8x128xf32> to vector<128xf32>
    %20 = vector.shape_cast %19 : vector<128xf32> to vector<1x128xf32>
    %c0_9 = arith.constant 0 : index
    %c0_10 = arith.constant 0 : index
    %21 = vector.load %arg3[%c0_9, %c0_10] : memref<1x128xf32, #tpu.memory_space<vmem>>, vector<1x128xf32>
    %cst_11 = arith.constant 0.000000e+00 : f32
    %22 = vector.broadcast %cst_11 : f32 to vector<1x128xf32>
    %23 = arith.cmpf ogt, %20, %22 : vector<1x128xf32>
    %cst_12 = arith.constant 1.000000e+00 : f32
    %24 = vector.broadcast %cst_12 : f32 to vector<1x128xf32>
    %25 = arith.select %23, %20, %24 : vector<1x128xi1>, vector<1x128xf32>
    %26 = arith.subf %21, %13 : vector<1x128xf32>
    %27 = math.exp %26 : vector<1x128xf32>
    %28 = tpu.reciprocal %25 : vector<1x128xf32> -> vector<1x128xf32>
    %29 = arith.mulf %27, %28 : vector<1x128xf32>
    %cst_13 = arith.constant 0.000000e+00 : f32
    %30 = vector.broadcast %cst_13 : f32 to vector<1x128xf32>
    %31 = arith.select %23, %29, %30 : vector<1x128xi1>, vector<1x128xf32>
    %c0_14 = arith.constant 0 : index
    %c0_15 = arith.constant 0 : index
    %32 = vector.load %arg8[%c0_14, %c0_15] : memref<1x128xf32, #tpu.memory_space<vmem>>, vector<1x128xf32>
    tpu.vector_store %arg8[%c0_14, %c0_15], %31 {strides = array<i32>} : memref<1x128xf32, #tpu.memory_space<vmem>>, vector<1x128xf32>,
    %cst_16 = arith.constant 0.000000e+00 : f32
    %33 = vector.shape_cast %31 : vector<1x128xf32> to vector<1x128xf32>
    %34 = vector.broadcast %33 : vector<1x128xf32> to vector<8x128xf32>
    %35 = vector.broadcast %cst_16 : f32 to vector<8x128xf32>
    %36 = arith.select %6, %34, %35 : vector<8x128xi1>, vector<8x128xf32>
    %c0_17 = arith.constant 0 : index
    %c0_18 = arith.constant 0 : index
    %37 = vector.load %arg7[%c0_17, %c0_18] : memref<8x128xf32, #tpu.memory_space<vmem>>, vector<8x128xf32>
    %c0_19 = arith.constant 0 : index
    %c0_20 = arith.constant 0 : index
    %38 = vector.load %arg2[%c0_19, %c0_20] : memref<128x128xbf16, #tpu.memory_space<vmem>>, vector<128x128xbf16>
    %39 = arith.extf %38 : vector<128x128xbf16> to vector<128x128xf32>
    %cst_21 = arith.constant dense<0.000000e+00> : vector<8x128xf32>
    %40 = tpu.matmul %36, %39, %cst_21 {dimension_numbers = #tpu.dot_dimension_numbers<[1], [0], [0], [1], [0, 0, 1, 1], [], []>} : vector<8x128xf32>, vector<128x128xf32>, vector<8x128xf32> -> vector<8x128xf32>
    %41 = arith.addf %37, %40 : vector<8x128xf32>
    %c0_22 = arith.constant 0 : index
    %c0_23 = arith.constant 0 : index
    %42 = vector.load %arg7[%c0_22, %c0_23] : memref<8x128xf32, #tpu.memory_space<vmem>>, vector<8x128xf32>
    tpu.vector_store %arg7[%c0_22, %c0_23], %41 {strides = array<i32>} : memref<8x128xf32, #tpu.memory_space<vmem>>, vector<8x128xf32>,
    return
  }
  func.func @transform_0(%arg0: i32, %arg1: i32) -> (i32, i32) {
    %c1_i32 = arith.constant 1 : i32
    %0 = arith.muli %arg0, %c1_i32 : i32
    %1 = arith.addi %0, %arg1 : i32
    %c0_i32 = arith.constant 0 : i32
    %c0_i32_0 = arith.constant 0 : i32
    return %1, %c0_i32 : i32, i32
  }
  func.func @transform_1(%arg0: i32, %arg1: i32) -> (i32, i32) {
    %c1_i32 = arith.constant 1 : i32
    %0 = arith.muli %arg0, %c1_i32 : i32
    %1 = arith.addi %0, %arg1 : i32
    %c0_i32 = arith.constant 0 : i32
    %c0_i32_0 = arith.constant 0 : i32
    return %c0_i32, %1 : i32, i32
  }
  func.func @transform_2(%arg0: i32, %arg1: i32) -> (i32, i32) {
    %c1_i32 = arith.constant 1 : i32
    %0 = arith.muli %arg0, %c1_i32 : i32
    %1 = arith.addi %0, %arg1 : i32
    %c0_i32 = arith.constant 0 : i32
    %c0_i32_0 = arith.constant 0 : i32
    return %c0_i32, %1 : i32, i32
  }
  func.func @transform_3(%arg0: i32, %arg1: i32) -> (i32, i32) {
    %c0_i32 = arith.constant 0 : i32
    %c0_i32_0 = arith.constant 0 : i32
    %c0_i32_1 = arith.constant 0 : i32
    return %c0_i32, %c0_i32_0 : i32, i32
  }
  func.func @transform_4(%arg0: i32, %arg1: i32) -> (i32, i32) {
    %c0_i32 = arith.constant 0 : i32
    %c0_i32_0 = arith.constant 0 : i32
    %c0_i32_1 = arith.constant 0 : i32
    return %c0_i32, %c0_i32_0 : i32, i32
  }
  func.func @transform_5(%arg0: i32, %arg1: i32) -> (i32, i32) {
    %c0_i32 = arith.constant 0 : i32
    %c0_i32_0 = arith.constant 0 : i32
    return %arg0, %c0_i32 : i32, i32
  }
  func.func @transform_6(%arg0: i32, %arg1: i32) -> (i32, i32) {
    %c1_i32 = arith.constant 1 : i32
    %0 = arith.muli %arg0, %c1_i32 : i32
    %1 = arith.addi %0, %arg1 : i32
    %c0_i32 = arith.constant 0 : i32
    %c0_i32_0 = arith.constant 0 : i32
    return %c0_i32, %1 : i32, i32
  }
}

module attributes {stable_mosaic.version = 11 : i64} {
  func.func @_cfconv_stats_kernel(%arg0: i32, %arg1: i32, %arg2: memref<128x128xbf16, #tpu.memory_space<vmem>>, %arg3: memref<128x128xbf16, #tpu.memory_space<vmem>>, %arg4: memref<1x128xi32, #tpu.memory_space<vmem>>, %arg5: memref<128x128xf32, #tpu.memory_space<vmem>>, %arg6: memref<1x128xf32, #tpu.memory_space<vmem>>, %arg7: memref<128x128xf32, #tpu.memory_space<vmem>>, %arg8: memref<1x128xf32, #tpu.memory_space<vmem>>, %arg9: memref<1x128xf32, #tpu.memory_space<vmem>>, %arg10: memref<128x128xbf16, #tpu.memory_space<vmem>>, %arg11: memref<1x128xf32, #tpu.memory_space<vmem>>, %arg12: memref<8x1xf32, #tpu.memory_space<vmem>>, %arg13: memref<8x1xf32, #tpu.memory_space<vmem>>) attributes {dimension_semantics = [#tpu.dimension_semantics<parallel>, #tpu.dimension_semantics<arbitrary>], iteration_bounds = array<i64: 1, 1>, scalar_prefetch = 0 : i64, scratch_operands = 0 : i64, tpu.core_type = #tpu.core_type<tc>, window_params = [{transform_indices = @transform_0, window_bounds = array<i64: 128, 128>}, {transform_indices = @transform_1, window_bounds = array<i64: 128, 128>}, {transform_indices = @transform_2, window_bounds = array<i64: 1, 128>}, {pipeline_mode = #tpu.pipeline_mode<synchronous>, transform_indices = @transform_3, window_bounds = array<i64: 128, 128>}, {pipeline_mode = #tpu.pipeline_mode<synchronous>, transform_indices = @transform_4, window_bounds = array<i64: 1, 128>}, {pipeline_mode = #tpu.pipeline_mode<synchronous>, transform_indices = @transform_5, window_bounds = array<i64: 128, 128>}, {pipeline_mode = #tpu.pipeline_mode<synchronous>, transform_indices = @transform_6, window_bounds = array<i64: 1, 128>}, {pipeline_mode = #tpu.pipeline_mode<synchronous>, transform_indices = @transform_7, window_bounds = array<i64: 1, 128>}, {transform_indices = @transform_8, window_bounds = array<i64: 128, 128>}, {transform_indices = @transform_9, window_bounds = array<i64: 1, 128>}, {transform_indices = @transform_10, window_bounds = array<i64: 8, 1>}, {transform_indices = @transform_11, window_bounds = array<i64: 8, 1>}]} {
    %c0_i32 = arith.constant 0 : i32
    %0 = arith.cmpi eq, %arg1, %c0_i32 : i32
    %1 = arith.extui %0 : i1 to i32
    %c0_i32_0 = arith.constant 0 : i32
    %2 = arith.cmpi ne, %1, %c0_i32_0 : i32
    scf.if %2 {
      %cst_36 = arith.constant -1.000000e+30 : f32
      %58 = vector.broadcast %cst_36 : f32 to vector<8x1xf32>
      %c0_37 = arith.constant 0 : index
      %c0_38 = arith.constant 0 : index
      %59 = vector.load %arg12[%c0_37, %c0_38] : memref<8x1xf32, #tpu.memory_space<vmem>>, vector<8x1xf32>
      tpu.vector_store %arg12[%c0_37, %c0_38], %58 {strides = array<i32>} : memref<8x1xf32, #tpu.memory_space<vmem>>, vector<8x1xf32>,
      %cst_39 = arith.constant 0.000000e+00 : f32
      %60 = vector.broadcast %cst_39 : f32 to vector<8x1xf32>
      %c0_40 = arith.constant 0 : index
      %c0_41 = arith.constant 0 : index
      %61 = vector.load %arg13[%c0_40, %c0_41] : memref<8x1xf32, #tpu.memory_space<vmem>>, vector<8x1xf32>
      tpu.vector_store %arg13[%c0_40, %c0_41], %60 {strides = array<i32>} : memref<8x1xf32, #tpu.memory_space<vmem>>, vector<8x1xf32>,
    } else {
    }
    %c0 = arith.constant 0 : index
    %c0_1 = arith.constant 0 : index
    %3 = vector.load %arg2[%c0, %c0_1] : memref<128x128xbf16, #tpu.memory_space<vmem>>, vector<128x128xbf16>
    %4 = arith.extf %3 : vector<128x128xbf16> to vector<128x128xf32>
    %c0_2 = arith.constant 0 : index
    %c0_3 = arith.constant 0 : index
    %5 = vector.load %arg3[%c0_2, %c0_3] : memref<128x128xbf16, #tpu.memory_space<vmem>>, vector<128x128xbf16>
    %6 = arith.extf %5 : vector<128x128xbf16> to vector<128x128xf32>
    %c0_4 = arith.constant 0 : index
    %c0_5 = arith.constant 0 : index
    %7 = vector.load %arg5[%c0_4, %c0_5] : memref<128x128xf32, #tpu.memory_space<vmem>>, vector<128x128xf32>
    %cst = arith.constant dense<0.000000e+00> : vector<128x128xf32>
    %8 = tpu.matmul %4, %7, %cst {dimension_numbers = #tpu.dot_dimension_numbers<[1], [0], [0], [1], [0, 0, 1, 1], [], []>} : vector<128x128xf32>, vector<128x128xf32>, vector<128x128xf32> -> vector<128x128xf32>
    %c0_6 = arith.constant 0 : index
    %c0_7 = arith.constant 0 : index
    %9 = vector.load %arg6[%c0_6, %c0_7] : memref<1x128xf32, #tpu.memory_space<vmem>>, vector<1x128xf32>
    %10 = vector.broadcast %9 : vector<1x128xf32> to vector<128x128xf32>
    %11 = arith.addf %8, %10 : vector<128x128xf32>
    %12 = math.tanh %11 : vector<128x128xf32>
    %c0_8 = arith.constant 0 : index
    %c0_9 = arith.constant 0 : index
    %13 = vector.load %arg7[%c0_8, %c0_9] : memref<128x128xf32, #tpu.memory_space<vmem>>, vector<128x128xf32>
    %cst_10 = arith.constant dense<0.000000e+00> : vector<128x128xf32>
    %14 = tpu.matmul %12, %13, %cst_10 {dimension_numbers = #tpu.dot_dimension_numbers<[1], [0], [0], [1], [0, 0, 1, 1], [], []>} : vector<128x128xf32>, vector<128x128xf32>, vector<128x128xf32> -> vector<128x128xf32>
    %c0_11 = arith.constant 0 : index
    %c0_12 = arith.constant 0 : index
    %15 = vector.load %arg8[%c0_11, %c0_12] : memref<1x128xf32, #tpu.memory_space<vmem>>, vector<1x128xf32>
    %16 = vector.broadcast %15 : vector<1x128xf32> to vector<128x128xf32>
    %17 = arith.addf %14, %16 : vector<128x128xf32>
    %18 = math.tanh %17 : vector<128x128xf32>
    %19 = arith.mulf %6, %18 : vector<128x128xf32>
    %20 = arith.truncf %19 : vector<128x128xf32> to vector<128x128xbf16>
    %c0_13 = arith.constant 0 : index
    %c0_14 = arith.constant 0 : index
    %21 = vector.load %arg10[%c0_13, %c0_14] : memref<128x128xbf16, #tpu.memory_space<vmem>>, vector<128x128xbf16>
    tpu.vector_store %arg10[%c0_13, %c0_14], %20 {strides = array<i32>} : memref<128x128xbf16, #tpu.memory_space<vmem>>, vector<128x128xbf16>,
    %c0_15 = arith.constant 0 : index
    %c0_16 = arith.constant 0 : index
    %22 = vector.load %arg9[%c0_15, %c0_16] : memref<1x128xf32, #tpu.memory_space<vmem>>, vector<1x128xf32>
    %cst_17 = arith.constant dense<0.000000e+00> : vector<1x128xf32>
    %23 = tpu.matmul %22, %19, %cst_17 {dimension_numbers = #tpu.dot_dimension_numbers<[1], [1], [0], [0], [0, 0, 1, 0], [], []>} : vector<1x128xf32>, vector<128x128xf32>, vector<1x128xf32> -> vector<1x128xf32>
    %c0_18 = arith.constant 0 : index
    %c0_19 = arith.constant 0 : index
    %24 = vector.load %arg11[%c0_18, %c0_19] : memref<1x128xf32, #tpu.memory_space<vmem>>, vector<1x128xf32>
    tpu.vector_store %arg11[%c0_18, %c0_19], %23 {strides = array<i32>} : memref<1x128xf32, #tpu.memory_space<vmem>>, vector<1x128xf32>,
    %25 = tpu.iota {dimensions = array<i32: 0>} : vector<8x128xi32>
    %c0_20 = arith.constant 0 : index
    %c0_21 = arith.constant 0 : index
    %26 = vector.load %arg4[%c0_20, %c0_21] : memref<1x128xi32, #tpu.memory_space<vmem>>, vector<1x128xi32>
    %27 = vector.broadcast %26 : vector<1x128xi32> to vector<8x128xi32>
    %28 = arith.cmpi eq, %27, %25 : vector<8x128xi32>
    %c0_22 = arith.constant 0 : index
    %c0_23 = arith.constant 0 : index
    %29 = vector.load %arg12[%c0_22, %c0_23] : memref<8x1xf32, #tpu.memory_space<vmem>>, vector<8x1xf32>
    %c0_24 = arith.constant 0 : index
    %c0_25 = arith.constant 0 : index
    %30 = vector.load %arg13[%c0_24, %c0_25] : memref<8x1xf32, #tpu.memory_space<vmem>>, vector<8x1xf32>
    %cst_26 = arith.constant -1.000000e+30 : f32
    %31 = vector.shape_cast %23 : vector<1x128xf32> to vector<1x128xf32>
    %32 = vector.broadcast %31 : vector<1x128xf32> to vector<8x128xf32>
    %33 = vector.broadcast %cst_26 : f32 to vector<8x128xf32>
    %34 = arith.select %28, %32, %33 : vector<8x128xi1>, vector<8x128xf32>
    %cst_27 = arith.constant dense<0xFF800000> : vector<8xf32>
    %35 = vector.multi_reduction <maximumf>, %34, %cst_27 [1] : vector<8x128xf32> to vector<8xf32>
    %36 = vector.shape_cast %35 : vector<8xf32> to vector<8x1xf32>
    %37 = arith.maximumf %29, %36 : vector<8x1xf32>
    %38 = arith.subf %29, %37 : vector<8x1xf32>
    %39 = math.exp %38 : vector<8x1xf32>
    %cst_28 = arith.constant 0.000000e+00 : f32
    %40 = vector.shape_cast %37 : vector<8x1xf32> to vector<8x1xf32>
    %41 = vector.broadcast %40 : vector<8x1xf32> to vector<8x128xf32>
    %42 = vector.broadcast %cst_28 : f32 to vector<8x128xf32>
    %43 = arith.select %28, %41, %42 : vector<8x128xi1>, vector<8x128xf32>
    %cst_29 = arith.constant dense<0.000000e+00> : vector<128xf32>
    %44 = vector.multi_reduction <add>, %43, %cst_29 [0] : vector<8x128xf32> to vector<128xf32>
    %45 = vector.shape_cast %44 : vector<128xf32> to vector<1x128xf32>
    %46 = arith.subf %23, %45 : vector<1x128xf32>
    %47 = math.exp %46 : vector<1x128xf32>
    %cst_30 = arith.constant 0.000000e+00 : f32
    %48 = vector.shape_cast %47 : vector<1x128xf32> to vector<1x128xf32>
    %49 = vector.broadcast %48 : vector<1x128xf32> to vector<8x128xf32>
    %50 = vector.broadcast %cst_30 : f32 to vector<8x128xf32>
    %51 = arith.select %28, %49, %50 : vector<8x128xi1>, vector<8x128xf32>
    %cst_31 = arith.constant dense<0.000000e+00> : vector<8xf32>
    %52 = vector.multi_reduction <add>, %51, %cst_31 [1] : vector<8x128xf32> to vector<8xf32>
    %53 = vector.shape_cast %52 : vector<8xf32> to vector<8x1xf32>
    %c0_32 = arith.constant 0 : index
    %c0_33 = arith.constant 0 : index
    %54 = vector.load %arg12[%c0_32, %c0_33] : memref<8x1xf32, #tpu.memory_space<vmem>>, vector<8x1xf32>
    tpu.vector_store %arg12[%c0_32, %c0_33], %37 {strides = array<i32>} : memref<8x1xf32, #tpu.memory_space<vmem>>, vector<8x1xf32>,
    %55 = arith.mulf %30, %39 : vector<8x1xf32>
    %56 = arith.addf %55, %53 : vector<8x1xf32>
    %c0_34 = arith.constant 0 : index
    %c0_35 = arith.constant 0 : index
    %57 = vector.load %arg13[%c0_34, %c0_35] : memref<8x1xf32, #tpu.memory_space<vmem>>, vector<8x1xf32>
    tpu.vector_store %arg13[%c0_34, %c0_35], %56 {strides = array<i32>} : memref<8x1xf32, #tpu.memory_space<vmem>>, vector<8x1xf32>,
    return
  }
  func.func @transform_0(%arg0: i32, %arg1: i32) -> (i32, i32) {
    %c1_i32 = arith.constant 1 : i32
    %0 = arith.muli %arg0, %c1_i32 : i32
    %1 = arith.addi %0, %arg1 : i32
    %c0_i32 = arith.constant 0 : i32
    %c0_i32_0 = arith.constant 0 : i32
    return %1, %c0_i32 : i32, i32
  }
  func.func @transform_1(%arg0: i32, %arg1: i32) -> (i32, i32) {
    %c1_i32 = arith.constant 1 : i32
    %0 = arith.muli %arg0, %c1_i32 : i32
    %1 = arith.addi %0, %arg1 : i32
    %c0_i32 = arith.constant 0 : i32
    %c0_i32_0 = arith.constant 0 : i32
    return %1, %c0_i32 : i32, i32
  }
  func.func @transform_2(%arg0: i32, %arg1: i32) -> (i32, i32) {
    %c1_i32 = arith.constant 1 : i32
    %0 = arith.muli %arg0, %c1_i32 : i32
    %1 = arith.addi %0, %arg1 : i32
    %c0_i32 = arith.constant 0 : i32
    %c0_i32_0 = arith.constant 0 : i32
    return %c0_i32, %1 : i32, i32
  }
  func.func @transform_3(%arg0: i32, %arg1: i32) -> (i32, i32) {
    %c0_i32 = arith.constant 0 : i32
    %c0_i32_0 = arith.constant 0 : i32
    %c0_i32_1 = arith.constant 0 : i32
    return %c0_i32, %c0_i32_0 : i32, i32
  }
  func.func @transform_4(%arg0: i32, %arg1: i32) -> (i32, i32) {
    %c0_i32 = arith.constant 0 : i32
    %c0_i32_0 = arith.constant 0 : i32
    %c0_i32_1 = arith.constant 0 : i32
    return %c0_i32, %c0_i32_0 : i32, i32
  }
  func.func @transform_5(%arg0: i32, %arg1: i32) -> (i32, i32) {
    %c0_i32 = arith.constant 0 : i32
    %c0_i32_0 = arith.constant 0 : i32
    %c0_i32_1 = arith.constant 0 : i32
    return %c0_i32, %c0_i32_0 : i32, i32
  }
  func.func @transform_6(%arg0: i32, %arg1: i32) -> (i32, i32) {
    %c0_i32 = arith.constant 0 : i32
    %c0_i32_0 = arith.constant 0 : i32
    %c0_i32_1 = arith.constant 0 : i32
    return %c0_i32, %c0_i32_0 : i32, i32
  }
  func.func @transform_7(%arg0: i32, %arg1: i32) -> (i32, i32) {
    %c0_i32 = arith.constant 0 : i32
    %c0_i32_0 = arith.constant 0 : i32
    %c0_i32_1 = arith.constant 0 : i32
    return %c0_i32, %c0_i32_0 : i32, i32
  }
  func.func @transform_8(%arg0: i32, %arg1: i32) -> (i32, i32) {
    %c1_i32 = arith.constant 1 : i32
    %0 = arith.muli %arg0, %c1_i32 : i32
    %1 = arith.addi %0, %arg1 : i32
    %c0_i32 = arith.constant 0 : i32
    %c0_i32_0 = arith.constant 0 : i32
    return %1, %c0_i32 : i32, i32
  }
  func.func @transform_9(%arg0: i32, %arg1: i32) -> (i32, i32) {
    %c1_i32 = arith.constant 1 : i32
    %0 = arith.muli %arg0, %c1_i32 : i32
    %1 = arith.addi %0, %arg1 : i32
    %c0_i32 = arith.constant 0 : i32
    %c0_i32_0 = arith.constant 0 : i32
    return %c0_i32, %1 : i32, i32
  }
  func.func @transform_10(%arg0: i32, %arg1: i32) -> (i32, i32) {
    %c0_i32 = arith.constant 0 : i32
    %c0_i32_0 = arith.constant 0 : i32
    return %arg0, %c0_i32 : i32, i32
  }
  func.func @transform_11(%arg0: i32, %arg1: i32) -> (i32, i32) {
    %c0_i32 = arith.constant 0 : i32
    %c0_i32_0 = arith.constant 0 : i32
    return %arg0, %c0_i32 : i32, i32
  }
}

</mosaic_0001>

<bundles_post_ra>
// kernel: _manual_cfconv_impl.3
= control target key start
LH: loop header
LB: loop body
LE: loop exit
PB: predicated region body
PF: predicated region fallthrough
CT: control target
= control target key end

     0   :  { %v278_v0 = vmov 0   ;;  %v86_v17 = vlaneseq  ;;  %s361_s4 = inlined_call_operand.vmem [shape: f32[8,1], index: 4, kind: input, shape index: {}]   ;;  %s362_s2 = inlined_call_operand.vmem [shape: s32[1,128], index: 2, kind: input, shape index: {}]   ;;  %s363_s3 = inlined_call_operand.vmem [shape: f32[8,1], index: 3, kind: input, shape index: {}]   ;;  %s364_s0 = inlined_call_operand.vmem [shape: bf16[128,128], index: 0, kind: input, shape index: {}]   ;;  %s365_s1 = inlined_call_operand.vmem [shape: f32[1,128], index: 1, kind: input, shape index: {}]   ;;  %s366_s6 = inlined_call_operand.vmem [shape: f32[1,128], index: 6, kind: output, shape index: {1}]   ;;  %s367_s5 = inlined_call_operand.vmem [shape: f32[8,128], index: 5, kind: output, shape index: {0}]  }
   0x1   :  { %272 = vset.pattern.permute.xlu0 %v278_v0  ;;  %v104_v1 = vld [vmem:[%s361_s4] sm:$0xff]  ;;  %v269_v3 = vld [vmem:[%s364_s0 + $0x38] sm:$0xff]   ;;  %v268_v6 = vld [vmem:[%s364_s0 + $0x30] sm:$0xff]  }
   0x2   :  { %107 = vperm.xlu0 %272, %v104_v1   ;;  %v91_v2 = vld [vmem:[%s363_s3] sm:$0xff]  ;;  %v262_v4 = vunpack.c.h.bf16 %v269_v3  ;;  %v261_v5 = vunpack.c.l.bf16 %v269_v3  ;;  %v258_v7 = vunpack.c.h.bf16 %v268_v6  ;;  %v257_v8 = vunpack.c.l.bf16 %v268_v6  ;;  %v267_v9 = vld [vmem:[%s364_s0 + $0x28] sm:$0xff]   ;;  %v265_v15 = vld [vmem:[%s364_s0 + $0x18] sm:$0xff]  }
   0x3   :  { %v254_v10 = vunpack.c.h.bf16 %v267_v9  ;;  %v253_v11 = vunpack.c.l.bf16 %v267_v9  ;;  %v266_v12 = vld [vmem:[%s364_s0 + $0x20] sm:$0xff]   ;;  %v246_v16 = vunpack.c.h.bf16 %v265_v15  ;;  %v245_v18 = vunpack.c.l.bf16 %v265_v15  ;;  %v264_v19 = vld [vmem:[%s364_s0 + $0x10] sm:$0xff]   ;;  %v263_v24 = vld [vmem:[%s364_s0 + $0x8] sm:$0xff]  }
   0x4   :  { %175 = vmatpush.msra.mxu0 %v262_v4  ;;  %v250_v13 = vunpack.c.h.bf16 %v266_v12  ;;  %v249_v14 = vunpack.c.l.bf16 %v266_v12  ;;  %v242_v20 = vunpack.c.h.bf16 %v264_v19  ;;  %v87_v21 = vshrl.u32 %v86_v17, 7  ;;  %v273_v22 = vld [vmem:[%s362_s2] ss:$0 sm:$0xff] }
   0x5   :  { %v241_v23 = vunpack.c.l.bf16 %v264_v19  ;;  %v238_v25 = vunpack.c.h.bf16 %v263_v24  ;;  %v232_v26 = vld [vmem:[%s364_s0] sm:$0xff]   ;;  %v237_v27 = vunpack.c.l.bf16 %v263_v24 }
   0x6   :  { %176 = vmatpush.msra.mxu0 %v261_v5  ;;  %vm90_vm0 = vcmp.eq.s32.totalorder %v273_v22, %v87_v21  ;;  %v234_v28 = vunpack.c.h.bf16 %v232_v26  ;;  %v233_v31 = vunpack.c.l.bf16 %v232_v26  ;;  %v117_v46 = vld [vmem:[%s365_s1] sm:$0x1] }
   0x8   :  { %177 = vmatpush.msra.mxu0 %v258_v7 }
   0xa   :  { %94 = vperm.xlu0 %272, %v91_v2   ;;  %178 = vmatpush.msra.mxu0 %v257_v8 }
   0xc   :  { %179 = vmatpush.msra.mxu0 %v254_v10 }
   0xe   :  { %180 = vmatpush.msra.mxu0 %v253_v11 }
  0x10   :  { %181 = vmatpush.msra.mxu0 %v250_v13 }
  0x12   :  { %182 = vmatpush.msra.mxu0 %v249_v14 }
  0x14   :  { %183 = vmatpush.msra.mxu0 %v246_v16 }
  0x16   :  { %184 = vmatpush.msra.mxu0 %v245_v18 }
  0x18   :  { %185 = vmatpush.msra.mxu0 %v242_v20 }
  0x1a   :  { %186 = vmatpush.msra.mxu0 %v241_v23 }
  0x1c   :  { %187 = vmatpush.msra.mxu0 %v238_v25 }
  0x1e   :  { %188 = vmatpush.msra.mxu0 %v237_v27 }
  0x20   :  { %189 = vmatpush.msra.mxu0 %v234_v28 }
  0x22   :  { %190 = vmatpush.msra.mxu0 %v233_v31 }
  0x74   :  { %v108_v29 = vpop.permute.xlu0 %107 }
  0x75   :  { %v110_v30 = vsel %vm90_vm0, %v108_v29, 0.0 }
  0x76   :  { %v111_v32 = vrot.slane %v110_v30, 4 }
  0x78   :  { %v112_v33 = vadd.f32 %v111_v32, %v110_v30 }
  0x7a   :  { %v113_v34 = vrot.slane %v112_v33, 2 }
  0x7c   :  { %v114_v35 = vadd.f32 %v113_v34, %v112_v33  ;;  %v95_v36 = vpop.permute.xlu0 %94 }
  0x7d   :  { %v97_v37 = vsel %vm90_vm0, %v95_v36, 0.0 }
  0x7e   :  { %v115_v38 = vrot.slane %v114_v35, 1  ;;  %v98_v39 = vrot.slane %v97_v37, 4 }
  0x80   :  { %v116_v40 = vadd.f32 %v115_v38, %v114_v35  ;;  %v99_v41 = vadd.f32 %v98_v39, %v97_v37 }
  0x82   :  { %v100_v42 = vrot.slane %v99_v41, 2  ;;  %vm118_vm1 = vcmp.gt.f32.partialorder %v116_v40, 0.0 }
  0x83   :  { %v119_v43 = vsel %vm118_vm1, %v116_v40, 1.0 }
  0x84   :  { %v101_v44 = vadd.f32 %v100_v42, %v99_v41  ;;  %274 = vrcp.f32 %v119_v43  ;;  %v134_v53 = vand.u32 2147483648, %v119_v43  ;;  %v132_v55 = vand.u32 2147483647, %v119_v43 }
  0x85   :  { %vm128_vm3 = vweird.f32 %v119_v43 }
  0x86   :  { %v102_v45 = vrot.slane %v101_v44, 1  ;;  %v135_v57 = vor.u32 1.1754944e-38, %v134_v53  ;;  %vm133_vm5 = vcmp.eq.f32.partialorder %v132_v55, 8.507059e+37 }
  0x88   :  { %v103_v47 = vadd.f32 %v102_v45, %v101_v44 }
  0x8a   :  { %v275_v48 = vpop.eup %274  ;;  %v120_v49 = vsub.f32 %v117_v46, %v103_v47 }
  0x8b   :  { %v124_v50 = vmul.f32 %v275_v48, %v119_v43  ;;  %vm129_vm2 = vweird.f32 %v275_v48 }
  0x8c   :  { %v121_v51 = vmul.f32 1.442695, %v120_v49  ;;  %vm130_vm4 = vmor %vm128_vm3, %vm129_vm2 }
  0x8d   :  { %v125_v52 = vsub.f32 1.0, %v124_v50 }
  0x8e   :  { %276 = vpow2.f32 %v121_v51 }
  0x8f   :  { %v126_v54 = vmul.f32 %v275_v48, %v125_v52 }
  0x91   :  { %v127_v56 = vadd.f32 %v275_v48, %v126_v54 }
  0x93   :  { %v131_v58 = vsel %vm130_vm4, %v275_v48, %v127_v56 }
  0x94   :  { %v277_v59 = vpop.eup %276  ;;  %v136_v60 = vsel %vm133_vm5, %v135_v57, %v131_v58 }
  0x95   :  { %v137_v61 = vmul.f32 %v277_v59, %v136_v60 }
  0x97   :  { %v138_v62 = vsel %vm118_vm1, %v137_v61, 0.0 }
  0x98   :  { %139 = vst [vmem:[%s366_s6] sm:$0x1] %v138_v62  ;;  %v140_v63 = vperm.slane %v138_v62, 0 }
  0x9a   :  { %230 = vmatmul.msk.f32.vlgmr.msra.gmra.mxu0 %vm90_vm0, %v140_v63 }
 0x117   :  { %v192_v0 = vpop.f32.mrf.mxu0 }
 0x118   :  { %196 = vst [vmem:[%s367_s5] sm:$0xff] %v192_v0 }

// kernel: _manual_cfconv_impl.2
= control target key start
LH: loop header
LB: loop body
LE: loop exit
PB: predicated region body
PF: predicated region fallthrough
CT: control target
= control target key end

     0   :  { %vm118_vm0 = vcmask 7168   ;;  %s1117_s3 = inlined_call_operand.vmem [shape: f32[128,128], index: 3, kind: input, shape index: {}]   ;;  %s1118_s4 = inlined_call_operand.vmem [shape: f32[1,128], index: 4, kind: input, shape index: {}]   ;;  %s1119_s0 = inlined_call_operand.vmem [shape: bf16[128,128], index: 0, kind: input, shape index: {}]   ;;  %s1120_s5 = inlined_call_operand.vmem [shape: f32[128,128], index: 5, kind: input, shape index: {}]   ;;  %s1121_s6 = inlined_call_operand.vmem [shape: f32[1,128], index: 6, kind: input, shape index: {}]   ;;  %s1122_s1 = inlined_call_operand.vmem [shape: bf16[128,128], index: 1, kind: input, shape index: {}]   ;;  %s1123_s8 = inlined_call_operand.vmem [shape: bf16[128,128], index: 8, kind: output, shape index: {0}]   ;;  %s1124_s7 = inlined_call_operand.vmem [shape: f32[1,128], index: 7, kind: input, shape index: {}]   ;;  %s1125_s2 = inlined_call_operand.vmem [shape: s32[1,128], index: 2, kind: input, shape index: {}]   ;;  %s1126_s10 = inlined_call_operand.vmem [shape: f32[8,1], index: 10, kind: output, shape index: {2}]   ;;  %s1127_s9 = inlined_call_operand.vmem [shape: f32[1,128], index: 9, kind: output, shape index: {1}]   ;;  %s1128_s11 = inlined_call_operand.vmem [shape: f32[8,1], index: 11, kind: output, shape index: {3}]  }
   0x1   :  { %v200_v0 = vld [vmem:[%s1117_s3 + $0x78] sm:$0xff]  ;;  %v199_v1 = vld [vmem:[%s1117_s3 + $0x70] sm:$0xff]  ;;  %v198_v2 = vld [vmem:[%s1117_s3 + $0x68] sm:$0xff] }
   0x2   :  { %205 = vmatpush.msra.mxu0 %v200_v0  ;;  %687 = vmatpush.msra.mxu3 %v200_v0  ;;  %v197_v3 = vld [vmem:[%s1117_s3 + $0x60] sm:$0xff]  ;;  %v196_v4 = vld [vmem:[%s1117_s3 + $0x58] sm:$0xff]  ;;  %v195_v5 = vld [vmem:[%s1117_s3 + $0x50] sm:$0xff] }
   0x3   :  { %v194_v6 = vld [vmem:[%s1117_s3 + $0x48] sm:$0xff]  ;;  %v193_v7 = vld [vmem:[%s1117_s3 + $0x40] sm:$0xff]  ;;  %v192_v8 = vld [vmem:[%s1117_s3 + $0x38] sm:$0xff] }
   0x4   :  { %206 = vmatpush.msra.mxu0 %v199_v1  ;;  %688 = vmatpush.msra.mxu3 %v199_v1  ;;  %v191_v9 = vld [vmem:[%s1117_s3 + $0x30] sm:$0xff]  ;;  %v190_v10 = vld [vmem:[%s1117_s3 + $0x28] sm:$0xff]  ;;  %v189_v11 = vld [vmem:[%s1117_s3 + $0x20] sm:$0xff] }
   0x5   :  { %v188_v12 = vld [vmem:[%s1117_s3 + $0x18] sm:$0xff]  ;;  %v187_v13 = vld [vmem:[%s1117_s3 + $0x10] sm:$0xff]  ;;  %v563_v14 = vld [vmem:[%s1119_s0] sm:$0xff]  }
   0x6   :  { %207 = vmatpush.msra.mxu0 %v198_v2  ;;  %689 = vmatpush.msra.mxu3 %v198_v2  ;;  %v186_v15 = vld [vmem:[%s1117_s3 + $0x8] sm:$0xff]  ;;  %v185_v16 = vld [vmem:[%s1117_s3] sm:$0xff]  ;;  %v564_v17 = vunpack.c.l.bf16 %v563_v14  ;;  %v565_v18 = vunpack.c.h.bf16 %v563_v14  ;;  %v667_v22 = vld [vmem:[%s1119_s0 + $0x10] sm:$0xff]  }
   0x7   :  { %v666_v19 = vld [vmem:[%s1119_s0 + $0x8] sm:$0xff]   ;;  %v572_v23 = vunpack.c.l.bf16 %v667_v22  ;;  %v573_v24 = vunpack.c.h.bf16 %v667_v22  ;;  %v301_v27 = vld [vmem:[%s1120_s5 + $0x78] sm:$0xff]  ;;  %v300_v29 = vld [vmem:[%s1120_s5 + $0x70] sm:$0xff] }
   0x8   :  { %208 = vmatpush.msra.mxu0 %v197_v3  ;;  %690 = vmatpush.msra.mxu3 %v197_v3  ;;  %v568_v20 = vunpack.c.l.bf16 %v666_v19  ;;  %v569_v21 = vunpack.c.h.bf16 %v666_v19  ;;  %v670_v25 = vld [vmem:[%s1119_s0 + $0x28] sm:$0xff]   ;;  %v668_v28 = vld [vmem:[%s1119_s0 + $0x18] sm:$0xff]   ;;  %v298_v32 = vld [vmem:[%s1120_s5 + $0x60] sm:$0xff] }
   0x9   :  { %v584_v26 = vunpack.c.l.bf16 %v670_v25  ;;  %306 = vmatpush.msra.mxu1 %v301_v27  ;;  %v299_v30 = vld [vmem:[%s1120_s5 + $0x68] sm:$0xff]  ;;  %v576_v31 = vunpack.c.l.bf16 %v668_v28  ;;  %v585_v33 = vunpack.c.h.bf16 %v670_v25  ;;  %v297_v34 = vld [vmem:[%s1120_s5 + $0x58] sm:$0xff]  ;;  %v296_v35 = vld [vmem:[%s1120_s5 + $0x50] sm:$0xff]  ;;  %v577_v38 = vunpack.c.h.bf16 %v668_v28 }
   0xa   :  { %209 = vmatpush.msra.mxu0 %v196_v4  ;;  %691 = vmatpush.msra.mxu3 %v196_v4  ;;  %v295_v36 = vld [vmem:[%s1120_s5 + $0x48] sm:$0xff]  ;;  %v671_v37 = vld [vmem:[%s1119_s0 + $0x30] sm:$0xff]   ;;  %v294_v39 = vld [vmem:[%s1120_s5 + $0x40] sm:$0xff] }
   0xb   :  { %307 = vmatpush.msra.mxu1 %v300_v29  ;;  %v588_v40 = vunpack.c.l.bf16 %v671_v37  ;;  %v293_v41 = vld [vmem:[%s1120_s5 + $0x38] sm:$0xff]  ;;  %v292_v42 = vld [vmem:[%s1120_s5 + $0x30] sm:$0xff]  ;;  %v669_v43 = vld [vmem:[%s1119_s0 + $0x20] sm:$0xff]   ;;  %v589_v46 = vunpack.c.h.bf16 %v671_v37 }
   0xc   :  { %210 = vmatpush.msra.mxu0 %v195_v5  ;;  %692 = vmatpush.msra.mxu3 %v195_v5  ;;  %v291_v44 = vld [vmem:[%s1120_s5 + $0x28] sm:$0xff]  ;;  %v580_v45 = vunpack.c.l.bf16 %v669_v43  ;;  %v672_v47 = vld [vmem:[%s1119_s0 + $0x38] sm:$0xff]   ;;  %v581_v48 = vunpack.c.h.bf16 %v669_v43  ;;  %v290_v51 = vld [vmem:[%s1120_s5 + $0x20] sm:$0xff] }
   0xd   :  { %308 = vmatpush.msra.mxu1 %v299_v30  ;;  %v592_v49 = vunpack.c.l.bf16 %v672_v47  ;;  %v593_v50 = vunpack.c.h.bf16 %v672_v47  ;;  %v289_v52 = vld [vmem:[%s1120_s5 + $0x18] sm:$0xff]  ;;  %v288_v53 = vld [vmem:[%s1120_s5 + $0x10] sm:$0xff]  ;;  %v287_v54 = vld [vmem:[%s1120_s5 + $0x8] sm:$0xff] }
   0xe   :  { %211 = vmatpush.msra.mxu0 %v194_v6  ;;  %693 = vmatpush.msra.mxu3 %v194_v6  ;;  %v286_v55 = vld [vmem:[%s1120_s5] sm:$0xff] }
   0xf   :  { %309 = vmatpush.msra.mxu1 %v298_v32  ;;  %v964_v56 = vld [vmem:[%s1118_s4] ss:$0 sm:$0xff] }
  0x10   :  { %212 = vmatpush.msra.mxu0 %v193_v7  ;;  %694 = vmatpush.msra.mxu3 %v193_v7 }
  0x11   :  { %310 = vmatpush.msra.mxu1 %v297_v34 }
  0x12   :  { %213 = vmatpush.msra.mxu0 %v192_v8  ;;  %695 = vmatpush.msra.mxu3 %v192_v8 }
  0x13   :  { %311 = vmatpush.msra.mxu1 %v296_v35 }
  0x14   :  { %214 = vmatpush.msra.mxu0 %v191_v9  ;;  %696 = vmatpush.msra.mxu3 %v191_v9 }
  0x15   :  { %312 = vmatpush.msra.mxu1 %v295_v36 }
  0x16   :  { %215 = vmatpush.msra.mxu0 %v190_v10  ;;  %697 = vmatpush.msra.mxu3 %v190_v10 }
  0x17   :  { %313 = vmatpush.msra.mxu1 %v294_v39 }
  0x18   :  { %216 = vmatpush.msra.mxu0 %v189_v11  ;;  %698 = vmatpush.msra.mxu3 %v189_v11 }
  0x19   :  { %314 = vmatpush.msra.mxu1 %v293_v41 }
  0x1a   :  { %217 = vmatpush.msra.mxu0 %v188_v12  ;;  %699 = vmatpush.msra.mxu3 %v188_v12 }
  0x1b   :  { %315 = vmatpush.msra.mxu1 %v292_v42  ;;  %v985_v42 = vld [vmem:[%s1121_s6] ss:$0 sm:$0xff] }
  0x1c   :  { %218 = vmatpush.msra.mxu0 %v187_v13  ;;  %700 = vmatpush.msra.mxu3 %v187_v13 }
  0x1d   :  { %316 = vmatpush.msra.mxu1 %v291_v44 }
  0x1e   :  { %219 = vmatpush.msra.mxu0 %v186_v15  ;;  %701 = vmatpush.msra.mxu3 %v186_v15 }
  0x1f   :  { %317 = vmatpush.msra.mxu1 %v290_v51 }
  0x20   :  { %220 = vmatpush.msra.mxu0 %v185_v16  ;;  %702 = vmatpush.msra.mxu3 %v185_v16 }
  0x21   :  { %221 = vmatmul.f32.vlgmr.msra.gmra.mxu0 %v564_v17  ;;  %251 = vmatmul.f32.vlgmr.msra.gmra.mxu3 %v584_v26 }
  0x22   :  { %318 = vmatpush.msra.mxu1 %v289_v52 }
  0x24   :  { %319 = vmatpush.msra.mxu1 %v288_v53 }
  0x26   :  { %320 = vmatpush.msra.mxu1 %v287_v54 }
  0x28   :  { %321 = vmatpush.msra.mxu1 %v286_v55 }
  0x29   :  { %224 = vmatmul.f32.gmra.mxu0 %v565_v18  ;;  %254 = vmatmul.f32.gmra.mxu3 %v585_v33 }
  0x31   :  { %227 = vmatmul.f32.gmra.mxu0 %v568_v20  ;;  %257 = vmatmul.f32.gmra.mxu3 %v588_v40 }
  0x39   :  { %230 = vmatmul.f32.gmra.mxu0 %v569_v21  ;;  %260 = vmatmul.f32.gmra.mxu3 %v589_v46  ;;  %v595_v46 = vld [vmem:[%s1122_s1] sm:$0xff]  }
  0x3a   :  { %v597_v47 = vunpack.c.h.bf16 %v595_v46 }
  0x41   :  { %233 = vmatmul.f32.gmra.mxu0 %v572_v23  ;;  %263 = vmatmul.f32.gmra.mxu3 %v592_v49 }
  0x49   :  { %236 = vmatmul.f32.gmra.mxu0 %v573_v24  ;;  %266 = vmatmul.f32.gmra.mxu3 %v593_v50 }
  0x51   :  { %239 = vmatmul.f32.gmra.mxu0 %v576_v31 }
  0x59   :  { %242 = vmatmul.f32.gmra.mxu0 %v577_v38 }
  0x61   :  { %245 = vmatmul.f32.gmra.mxu0 %v580_v45 }
  0x69   :  { %248 = vmatmul.f32.gmra.mxu0 %v581_v48  ;;  %v596_v48 = vunpack.c.l.bf16 %v595_v46 }
  0x9e   :  { %v222_v57 = vpop.f32.mrf.mxu0 }
  0x9f   :  { %v223_v58 = vadd.f32 %v964_v56, %v222_v57 }
  0xa1   :  { %710 = vtanh.f32 %v223_v58  ;;  %v673_v58 = vld [vmem:[%s1122_s1 + $0x8] sm:$0xff]  }
  0xa4   :  { %v252_v17 = vpop.f32.mrf.mxu3 }
  0xa5   :  { %v253_v24 = vadd.f32 %v964_v56, %v252_v17 }
  0xa6   :  { %v225_v59 = vpop.f32.mrf.mxu0 }
  0xa7   :  { %v711_v60 = vpop.eup %710  ;;  %v226_v61 = vadd.f32 %v964_v56, %v225_v59  ;;  %v601_v59 = vunpack.c.h.bf16 %v673_v58 }
  0xa8   :  { %322 = vmatmul.f32.vlgmr.msra.gmra.mxu1 %v711_v60  ;;  %v600_v60 = vunpack.c.l.bf16 %v673_v58 }
  0xa9   :  { %712 = vtanh.f32 %v226_v61 }
  0xac   :  { %v255_v23 = vpop.f32.mrf.mxu3 }
  0xad   :  { %v256_v27 = vadd.f32 %v964_v56, %v255_v23 }
  0xae   :  { %v228_v62 = vpop.f32.mrf.mxu0 }
  0xaf   :  { %v713_v63 = vpop.eup %712  ;;  %v229_v0 = vadd.f32 %v964_v56, %v228_v62 }
  0xb0   :  { %325 = vmatmul.f32.gmra.mxu1 %v713_v63 }
  0xb1   :  { %714 = vtanh.f32 %v229_v0 }
  0xb4   :  { %v258_v26 = vpop.f32.mrf.mxu3 }
  0xb5   :  { %v259_v29 = vadd.f32 %v964_v56, %v258_v26 }
  0xb6   :  { %v231_v1 = vpop.f32.mrf.mxu0 }
  0xb7   :  { %v715_v2 = vpop.eup %714  ;;  %v232_v3 = vadd.f32 %v964_v56, %v231_v1 }
  0xb8   :  { %328 = vmatmul.f32.gmra.mxu1 %v715_v2 }
  0xb9   :  { %716 = vtanh.f32 %v232_v3 }
  0xbc   :  { %v261_v30 = vpop.f32.mrf.mxu3 }
  0xbd   :  { %v262_v32 = vadd.f32 %v964_v56, %v261_v30  ;;  %v676_v30 = vld [vmem:[%s1122_s1 + $0x20] sm:$0xff]  }
  0xbe   :  { %v234_v4 = vpop.f32.mrf.mxu0 }
  0xbf   :  { %v717_v5 = vpop.eup %716  ;;  %v235_v6 = vadd.f32 %v964_v56, %v234_v4 }
  0xc0   :  { %331 = vmatmul.f32.gmra.mxu1 %v717_v5 }
  0xc1   :  { %718 = vtanh.f32 %v235_v6  ;;  %v674_v6 = vld [vmem:[%s1122_s1 + $0x10] sm:$0xff]  }
  0xc4   :  { %v264_v34 = vpop.f32.mrf.mxu3 }
  0xc5   :  { %v265_v35 = vadd.f32 %v964_v56, %v264_v34 }
  0xc6   :  { %v237_v7 = vpop.f32.mrf.mxu0 }
  0xc7   :  { %v719_v8 = vpop.eup %718  ;;  %v238_v9 = vadd.f32 %v964_v56, %v237_v7  ;;  %v605_v7 = vunpack.c.h.bf16 %v674_v6 }
  0xc8   :  { %334 = vmatmul.f32.gmra.mxu1 %v719_v8  ;;  %v604_v8 = vunpack.c.l.bf16 %v674_v6 }
  0xc9   :  { %720 = vtanh.f32 %v238_v9 }
  0xcc   :  { %v267_v37 = vpop.f32.mrf.mxu3 }
  0xcd   :  { %v268_v38 = vadd.f32 %v964_v56, %v267_v37 }
  0xce   :  { %v240_v10 = vpop.f32.mrf.mxu0 }
  0xcf   :  { %v721_v11 = vpop.eup %720  ;;  %v241_v12 = vadd.f32 %v964_v56, %v240_v10 }
  0xd0   :  { %337 = vmatmul.f32.gmra.mxu1 %v721_v11 }
  0xd1   :  { %722 = vtanh.f32 %v241_v12 }
  0xd6   :  { %v243_v13 = vpop.f32.mrf.mxu0 }
  0xd7   :  { %v723_v14 = vpop.eup %722  ;;  %v244_v15 = vadd.f32 %v964_v56, %v243_v13 }
  0xd8   :  { %340 = vmatmul.f32.gmra.mxu1 %v723_v14 }
  0xd9   :  { %724 = vtanh.f32 %v244_v15 }
  0xde   :  { %v246_v16 = vpop.f32.mrf.mxu0 }
  0xdf   :  { %v725_v18 = vpop.eup %724  ;;  %v247_v19 = vadd.f32 %v964_v56, %v246_v16 }
  0xe0   :  { %343 = vmatmul.f32.gmra.mxu1 %v725_v18  ;;  %v675_v18 = vld [vmem:[%s1122_s1 + $0x18] sm:$0xff]  }
  0xe1   :  { %726 = vtanh.f32 %v247_v19  ;;  %v609_v19 = vunpack.c.h.bf16 %v675_v18 }
  0xe6   :  { %v249_v20 = vpop.f32.mrf.mxu0 }
  0xe7   :  { %v727_v21 = vpop.eup %726  ;;  %v250_v22 = vadd.f32 %v964_v56, %v249_v20  ;;  %v608_v20 = vunpack.c.l.bf16 %v675_v18  ;;  %v779_v18 = vmov 0  }
  0xe8   :  { %346 = vmatmul.f32.gmra.mxu1 %v727_v21  ;;  %706 = vset.pattern.permute.xlu0 %v779_v18 }
  0xe9   :  { %728 = vtanh.f32 %v250_v22 }
  0xea   :  { %730 = vtanh.f32 %v253_v24 }
  0xeb   :  { %732 = vtanh.f32 %v256_v27 }
  0xec   :  { %734 = vtanh.f32 %v259_v29 }
  0xed   :  { %736 = vtanh.f32 %v262_v32  ;;  %v612_v32 = vunpack.c.l.bf16 %v676_v30 }
  0xee   :  { %738 = vtanh.f32 %v265_v35 }
  0xef   :  { %v729_v25 = vpop.eup %728  ;;  %740 = vtanh.f32 %v268_v38 }
  0xf0   :  { %349 = vmatmul.f32.gmra.mxu1 %v729_v25  ;;  %v731_v28 = vpop.eup %730 }
  0xf1   :  { %v733_v31 = vpop.eup %732 }
  0xf2   :  { %v735_v33 = vpop.eup %734 }
  0xf3   :  { %v737_v36 = vpop.eup %736 }
  0xf4   :  { %v739_v39 = vpop.eup %738 }
  0xf5   :  { %v741_v40 = vpop.eup %740 }
  0xf8   :  { %352 = vmatmul.f32.gmra.mxu1 %v731_v28 }
 0x100   :  { %355 = vmatmul.f32.gmra.mxu1 %v733_v31  ;;  %v613_v31 = vunpack.c.h.bf16 %v676_v30 }
 0x108   :  { %358 = vmatmul.f32.gmra.mxu1 %v735_v33 }
 0x110   :  { %361 = vmatmul.f32.gmra.mxu1 %v737_v36 }
 0x118   :  { %364 = vmatmul.f32.gmra.mxu1 %v739_v39 }
 0x120   :  { %367 = vmatmul.f32.gmra.mxu1 %v741_v40 }
 0x125   :  { %v323_v41 = vpop.f32.mrf.mxu1 }
 0x126   :  { %v324_v43 = vadd.f32 %v985_v42, %v323_v41 }
 0x128   :  { %742 = vtanh.f32 %v324_v43  ;;  %v677_v43 = vld [vmem:[%s1122_s1 + $0x28] sm:$0xff]  }
 0x12d   :  { %v326_v44 = vpop.f32.mrf.mxu1 }
 0x12e   :  { %v327_v45 = vadd.f32 %v985_v42, %v326_v44  ;;  %v743_v49 = vpop.eup %742  ;;  %v617_v44 = vunpack.c.h.bf16 %v677_v43 }
 0x12f   :  { %v994_v53 = vmul.f32 %v743_v49, %v596_v48 }
 0x130   :  { %744 = vtanh.f32 %v327_v45  ;;  %v616_v45 = vunpack.c.l.bf16 %v677_v43 }
 0x135   :  { %v329_v50 = vpop.f32.mrf.mxu1 }
 0x136   :  { %v745_v51 = vpop.eup %744  ;;  %v330_v55 = vadd.f32 %v985_v42, %v329_v50 }
 0x137   :  { %v992_v52 = vmul.f32 %v745_v51, %v597_v47 }
 0x138   :  { %746 = vtanh.f32 %v330_v55 }
 0x139   :  { %v629_v54 = vpack.c.bf16 %v992_v52, %v994_v53 }
 0x13b   :  { %630 = vst [vmem:[%s1123_s8] sm:$0xff] %v629_v54  }
 0x13d   :  { %v332_v56 = vpop.f32.mrf.mxu1 }
 0x13e   :  { %v333_v57 = vadd.f32 %v985_v42, %v332_v56  ;;  %v747_v61 = vpop.eup %746 }
 0x13f   :  { %v1008_v1 = vmul.f32 %v747_v61, %v600_v60 }
 0x140   :  { %748 = vtanh.f32 %v333_v57  ;;  %v678_v57 = vld [vmem:[%s1122_s1 + $0x30] sm:$0xff]  }
 0x141   :  { %v621_v58 = vunpack.c.h.bf16 %v678_v57 }
 0x145   :  { %v335_v62 = vpop.f32.mrf.mxu1 }
 0x146   :  { %v749_v63 = vpop.eup %748  ;;  %v336_v3 = vadd.f32 %v985_v42, %v335_v62 }
 0x147   :  { %v1006_v0 = vmul.f32 %v749_v63, %v601_v59  ;;  %v620_v59 = vunpack.c.l.bf16 %v678_v57 }
 0x148   :  { %750 = vtanh.f32 %v336_v3 }
 0x149   :  { %v634_v2 = vpack.c.bf16 %v1006_v0, %v1008_v1 }
 0x14b   :  { %680 = vst [vmem:[%s1123_s8 + $0x8] sm:$0xff] %v634_v2  }
 0x14d   :  { %v338_v4 = vpop.f32.mrf.mxu1 }
 0x14e   :  { %v339_v5 = vadd.f32 %v985_v42, %v338_v4  ;;  %v751_v9 = vpop.eup %750 }
 0x14f   :  { %v1022_v13 = vmul.f32 %v751_v9, %v604_v8 }
 0x150   :  { %752 = vtanh.f32 %v339_v5 }
 0x155   :  { %v341_v10 = vpop.f32.mrf.mxu1 }
 0x156   :  { %v753_v11 = vpop.eup %752  ;;  %v342_v15 = vadd.f32 %v985_v42, %v341_v10 }
 0x157   :  { %v1020_v12 = vmul.f32 %v753_v11, %v605_v7  ;;  %v679_v7 = vld [vmem:[%s1122_s1 + $0x38] sm:$0xff]  }
 0x158   :  { %754 = vtanh.f32 %v342_v15  ;;  %v625_v8 = vunpack.c.h.bf16 %v679_v7  ;;  %v624_v9 = vunpack.c.l.bf16 %v679_v7 }
 0x159   :  { %v639_v14 = vpack.c.bf16 %v1020_v12, %v1022_v13 }
 0x15b   :  { %681 = vst [vmem:[%s1123_s8 + $0x10] sm:$0xff] %v639_v14  }
 0x15d   :  { %v344_v16 = vpop.f32.mrf.mxu1 }
 0x15e   :  { %v345_v17 = vadd.f32 %v985_v42, %v344_v16  ;;  %v755_v21 = vpop.eup %754 }
 0x15f   :  { %v1036_v25 = vmul.f32 %v755_v21, %v608_v20 }
 0x160   :  { %756 = vtanh.f32 %v345_v17  ;;  %v778_v17 = vmov -1e+30  }
 0x161   :  { %119 = vst.msk [vmem:[%s1126_s10] sm:$0xff] %vm118_vm0, %v778_v17 }
 0x165   :  { %v347_v22 = vpop.f32.mrf.mxu1 }
 0x166   :  { %v757_v23 = vpop.eup %756  ;;  %v348_v27 = vadd.f32 %v985_v42, %v347_v22 }
 0x167   :  { %v1034_v24 = vmul.f32 %v757_v23, %v609_v19  ;;  %v780_v19 = vmov 0.0  }
 0x168   :  { %758 = vtanh.f32 %v348_v27  ;;  %120 = vst.msk [vmem:[%s1128_s11] sm:$0xff] %vm118_vm0, %v780_v19  ;;  %v462_v20 = vld [vmem:[%s1126_s10] sm:$0xff] }
 0x169   :  { %v644_v26 = vpack.c.bf16 %v1034_v24, %v1036_v25 }
 0x16b   :  { %682 = vst [vmem:[%s1123_s8 + $0x18] sm:$0xff] %v644_v26  }
 0x16d   :  { %v350_v28 = vpop.f32.mrf.mxu1 }
 0x16e   :  { %v351_v29 = vadd.f32 %v985_v42, %v350_v28  ;;  %v759_v33 = vpop.eup %758 }
 0x16f   :  { %v395_v37 = vmul.f32 %v759_v33, %v612_v32 }
 0x170   :  { %760 = vtanh.f32 %v351_v29 }
 0x175   :  { %v353_v34 = vpop.f32.mrf.mxu1 }
 0x176   :  { %v761_v35 = vpop.eup %760  ;;  %v354_v39 = vadd.f32 %v985_v42, %v353_v34 }
 0x177   :  { %v396_v36 = vmul.f32 %v761_v35, %v613_v31 }
 0x178   :  { %762 = vtanh.f32 %v354_v39  ;;  %v463_v39 = vld [vmem:[%s1128_s11] sm:$0xff] }
 0x179   :  { %v649_v38 = vpack.c.bf16 %v396_v36, %v395_v37 }
 0x17b   :  { %683 = vst [vmem:[%s1123_s8 + $0x20] sm:$0xff] %v649_v38  }
 0x17d   :  { %v356_v40 = vpop.f32.mrf.mxu1 }
 0x17e   :  { %v357_v41 = vadd.f32 %v985_v42, %v356_v40  ;;  %v763_v46 = vpop.eup %762 }
 0x17f   :  { %v397_v50 = vmul.f32 %v763_v46, %v616_v45 }
 0x180   :  { %764 = vtanh.f32 %v357_v41 }
 0x185   :  { %v359_v47 = vpop.f32.mrf.mxu1 }
 0x186   :  { %v765_v48 = vpop.eup %764  ;;  %v360_v54 = vadd.f32 %v985_v42, %v359_v47 }
 0x187   :  { %v398_v49 = vmul.f32 %v765_v48, %v617_v44 }
 0x188   :  { %766 = vtanh.f32 %v360_v54 }
 0x189   :  { %v654_v51 = vpack.c.bf16 %v398_v49, %v397_v50 }
 0x18b   :  { %684 = vst [vmem:[%s1123_s8 + $0x28] sm:$0xff] %v654_v51  }
 0x18d   :  { %v362_v55 = vpop.f32.mrf.mxu1 }
 0x18e   :  { %v363_v56 = vadd.f32 %v985_v42, %v362_v55  ;;  %v767_v60 = vpop.eup %766 }
 0x18f   :  { %v399_v2 = vmul.f32 %v767_v60, %v620_v59 }
 0x190   :  { %768 = vtanh.f32 %v363_v56 }
 0x195   :  { %v365_v61 = vpop.f32.mrf.mxu1 }
 0x196   :  { %v769_v62 = vpop.eup %768  ;;  %v366_v4 = vadd.f32 %v985_v42, %v365_v61 }
 0x197   :  { %v400_v63 = vmul.f32 %v769_v62, %v621_v58 }
 0x198   :  { %770 = vtanh.f32 %v366_v4 }
 0x199   :  { %v659_v3 = vpack.c.bf16 %v400_v63, %v399_v2 }
 0x19b   :  { %685 = vst [vmem:[%s1123_s8 + $0x30] sm:$0xff] %v659_v3  }
 0x19d   :  { %v368_v5 = vpop.f32.mrf.mxu1 }
 0x19e   :  { %v369_v6 = vadd.f32 %v985_v42, %v368_v5  ;;  %v771_v10 = vpop.eup %770  ;;  %v435_v42 = vld [vmem:[%s1124_s7] sm:$0x1] }
 0x19f   :  { %v401_v15 = vmul.f32 %v771_v10, %v624_v9 }
 0x1a0   :  { %772 = vtanh.f32 %v369_v6 }
 0x1a6   :  { %v773_v11 = vpop.eup %772 }
 0x1a7   :  { %v402_v14 = vmul.f32 %v773_v11, %v625_v8 }
 0x1a9   :  { %436 = vmatpush.xpose.msra.mxu2 %v402_v14  ;;  %v664_v16 = vpack.c.bf16 %v402_v14, %v401_v15 }
 0x1ab   :  { %686 = vst [vmem:[%s1123_s8 + $0x38] sm:$0xff] %v664_v16  }
 0x1ad   :  { %437 = vmatpush.xpose.msra.mxu2 %v401_v15 }
 0x1b1   :  { %438 = vmatpush.xpose.msra.mxu2 %v400_v63 }
 0x1b5   :  { %439 = vmatpush.xpose.msra.mxu2 %v399_v2 }
 0x1b9   :  { %440 = vmatpush.xpose.msra.mxu2 %v398_v49 }
 0x1bd   :  { %441 = vmatpush.xpose.msra.mxu2 %v397_v50 }
 0x1c1   :  { %442 = vmatpush.xpose.msra.mxu2 %v396_v36 }
 0x1c5   :  { %443 = vmatpush.xpose.msra.mxu2 %v395_v37 }
 0x1c9   :  { %444 = vmatpush.xpose.msra.mxu2 %v1034_v24 }
 0x1cd   :  { %445 = vmatpush.xpose.msra.mxu2 %v1036_v25 }
 0x1d1   :  { %446 = vmatpush.xpose.msra.mxu2 %v1020_v12  ;;  %v457_v12 = vlaneseq }
 0x1d5   :  { %447 = vmatpush.xpose.msra.mxu2 %v1022_v13 }
 0x1d9   :  { %448 = vmatpush.xpose.msra.mxu2 %v1006_v0  ;;  %v458_v0 = vshrl.u32 %v457_v12, 7 }
 0x1dd   :  { %449 = vmatpush.xpose.msra.mxu2 %v1008_v1 }
 0x1e1   :  { %450 = vmatpush.xpose.msra.mxu2 %v992_v52  ;;  %v709_v52 = vld [vmem:[%s1125_s2] ss:$0 sm:$0xff] }
 0x1e2   :  { %vm461_vm1 = vcmp.eq.s32.totalorder %v709_v52, %v458_v0 }
 0x1e5   :  { %451 = vmatpush.xpose.msra.mxu2 %v994_v53 }
 0x1e8   :  { %452 = vmatmul.f32.vlgmr.msra.gmra.mxu2 %v435_v42 }
 0x26b   :  { %v453_v1 = vpop.f32.mrf.mxu2 }
 0x26c   :  { %456 = vst [vmem:[%s1127_s9] sm:$0x1] %v453_v1  ;;  %v464_v53 = vperm.slane %v453_v1, 0 }
 0x26e   :  { %v465_v13 = vsel %vm461_vm1, %v464_v53, -1e+30 }
 0x26f   :  { %466 = vmax.xlane.f32.xlu0 %v465_v13 }
 0x2e2   :  { %v467_v21 = vpop.xlane.xlu0 %466 }
 0x2e3   :  { %v468_v22 = vmax.f32 %v462_v20, %v467_v21 }
 0x2e5   :  { %v469_v23 = vsub.f32 %v462_v20, %v468_v22  ;;  %492 = vst.msk [vmem:[%s1126_s10] sm:$0xff] %vm118_vm0, %v468_v22  ;;  %474 = vperm.xlu0 %706, %v468_v22  }
 0x2e7   :  { %v470_v37 = vmul.f32 1.442695, %v469_v23 }
 0x357   :  { %v475_v24 = vpop.permute.xlu0 %474 }
 0x358   :  { %v477_v25 = vsel %vm461_vm1, %v475_v24, 0.0 }
 0x359   :  { %v478_v26 = vrot.slane %v477_v25, 4 }
 0x35b   :  { %v479_v27 = vadd.f32 %v478_v26, %v477_v25 }
 0x35d   :  { %v480_v28 = vrot.slane %v479_v27, 2 }
 0x35f   :  { %v481_v29 = vadd.f32 %v480_v28, %v479_v27 }
 0x361   :  { %v482_v30 = vrot.slane %v481_v29, 1 }
 0x363   :  { %v483_v31 = vadd.f32 %v482_v30, %v481_v29 }
 0x365   :  { %v484_v32 = vsub.f32 %v453_v1, %v483_v31 }
 0x367   :  { %v485_v33 = vmul.f32 1.442695, %v484_v32 }
 0x369   :  { %774 = vpow2.f32 %v485_v33 }
 0x36a   :  { %776 = vpow2.f32 %v470_v37 }
 0x36f   :  { %v775_v34 = vpop.eup %774 }
 0x370   :  { %v487_v35 = vperm.slane %v775_v34, 0  ;;  %v777_v38 = vpop.eup %776 }
 0x371   :  { %v493_v40 = vmul.f32 %v777_v38, %v463_v39 }
 0x372   :  { %v488_v36 = vsel %vm461_vm1, %v487_v35, 0.0 }
 0x373   :  { %489 = vadd.xlane.f32.xlu1 %v488_v36 }
 0x3e6   :  { %v490_v41 = vpop.xlane.xlu1 %489 }
 0x3e7   :  { %v494_v43 = vadd.f32 %v493_v40, %v490_v41 }
 0x3e9   :  { %495 = vst.msk [vmem:[%s1128_s11] sm:$0xff] %vm118_vm0, %v494_v43 }

</bundles_post_ra>
